<compile_context>
chip_gen: v7x
topology: tpu7x:2x2x1
jax: 0.10.0
libtpu: 0.0.40
codegen_flags: <defaults>
</compile_context>

<pallas_src>
import math
import functools

import jax
import jax.numpy as jnp
from jax import lax
from jax.experimental import pallas as pl
from jax.experimental.pallas import tpu as pltpu


SUBLANE = 8      # f32 sublane quantum
LANE = 128       # lane width


def _round_up(x, m):
    return ((x + m - 1) // m) * m


# ----------------------------- Pallas kernel ------------------------------ #
def lstm_block_kernel(x_ref, sbias_ref, w_ih_ref, w_hh_ref, w_p_ref, b_p_ref,
                      y_ref, h_ref, c_ref, h_all_ref, pre_ref, *,
                      hidden_size, t_block, batch_pad):
    """One grid step == one block of `t_block` timesteps.

    x_ref     : (t_block*B_pad, n_ts)  time-major rows (batch-minor per step)
    sbias_ref : (B_pad, 4H)            bias + static-feature projection
    y_ref     : (t_block*B_pad, C_out_pad)  lane-dense output slab
    h_ref,c_ref : (B_pad, H) VMEM carry, persists across grid steps
    h_all_ref : (t_block*B_pad, H) VMEM staging for the batched projection
    pre_ref   : (t_block*B_pad, 4H) VMEM staging for the hoisted input proj
    """
    blk = pl.program_id(0)

    @pl.when(blk == 0)
    def _():
        h_ref[...] = jnp.zeros_like(h_ref)
        c_ref[...] = jnp.zeros_like(c_ref)

    H = hidden_size
    B = batch_pad

    # Hoisted, time-independent input projection for the whole block: one big
    # MXU matmul, staged in VMEM so the serial loop only reads (B, 4H) slices.
    pre_ref[...] = jnp.dot(x_ref[...], w_ih_ref[...],
                           preferred_element_type=jnp.float32)

    # Hoist weight / bias loads out of the serial loop.
    w_hh = w_hh_ref[...]          # (H, 4H)
    sbias = sbias_ref[...]        # (B, 4H)

    def step(t, carry):
        h, c = carry
        row = t * B
        if not isinstance(row, int):
            row = pl.multiple_of(row, B)          # B_pad is a multiple of 8
        pre_t = pre_ref[pl.ds(row, B), :]                         # (B, 4H)
        gates = pre_t + sbias + jnp.dot(h, w_hh,
                                        preferred_element_type=jnp.float32)
        # Two full-width (4H-lane) EUP pushes instead of 5 narrow ones.
        sig = jax.nn.sigmoid(gates)
        tnh = jnp.tanh(gates)
        i_g = sig[:, 0 * H:1 * H]
        f_g = sig[:, 1 * H:2 * H]
        g_g = tnh[:, 2 * H:3 * H]
        o_g = sig[:, 3 * H:4 * H]
        c = f_g * c + i_g * g_g
        h = o_g * jnp.tanh(c)
        h_all_ref[pl.ds(row, B), :] = h                           # stage h_t
        return (h, c)

    carry0 = (h_ref[...], c_ref[...])
    if t_block <= 16:
        # Small, compile-time-known trip count: static unroll (all offsets static).
        carry = carry0
        for t in range(t_block):
            carry = step(t, carry)
        h, c = carry
    else:
        # Large blocks: bounded vreg pressure + LLO visibility via partial unroll.
        h, c = lax.fori_loop(0, t_block, step, carry0, unroll=8)

    h_ref[...] = h
    c_ref[...] = c

    # Batched, lane-dense output projection once per block.
    y_ref[...] = (jnp.dot(h_all_ref[...], w_p_ref[...],
                          preferred_element_type=jnp.float32)
                  + b_p_ref[...]).astype(y_ref.dtype)


def lstm_project_pallas(x_tm, sbias, w_ih_ts_t, w_hh_t, w_proj_t_pad,
                        b_proj_pad, hidden_size, t_block=64):
    """x_tm: time-major input (T, B_pad, n_ts), batch already padded to 8.

    Returns (T_pad, B_pad, C_out_pad) float32; caller slices off padding.
    """
    T, B_pad, n_ts = x_tm.shape
    H = hidden_size
    H4 = 4 * H
    C_out_pad = w_proj_t_pad.shape[1]

    t_block = max(1, min(t_block, T))
    num_blocks = pl.cdiv(T, t_block)
    T_pad = num_blocks * t_block
    if T_pad != T:
        # zero-pad trailing timesteps; they are computed then sliced off.
        x_tm = jnp.pad(x_tm, ((0, T_pad - T), (0, 0), (0, 0)))
    x_flat = x_tm.reshape(T_pad * B_pad, n_ts)

    kernel = functools.partial(lstm_block_kernel, hidden_size=H,
                               t_block=t_block, batch_pad=B_pad)

    y_flat = pl.pallas_call(
        kernel,
        out_shape=jax.ShapeDtypeStruct((T_pad * B_pad, C_out_pad), jnp.float32),
        grid_spec=pltpu.PrefetchScalarGridSpec(
            num_scalar_prefetch=0,
            grid=(num_blocks,),
            in_specs=[
                pl.BlockSpec((t_block * B_pad, n_ts), lambda i: (i, 0)),   # x block
                pl.BlockSpec((B_pad, H4), lambda i: (0, 0)),               # sbias
                pl.BlockSpec((n_ts, H4), lambda i: (0, 0)),                # W_ih_ts^T
                pl.BlockSpec((H, H4), lambda i: (0, 0)),                   # W_hh^T
                pl.BlockSpec((H, C_out_pad), lambda i: (0, 0)),            # W_proj^T (lane-padded)
                pl.BlockSpec((1, C_out_pad), lambda i: (0, 0)),            # b_proj (lane-padded)
            ],
            out_specs=pl.BlockSpec((t_block * B_pad, C_out_pad), lambda i: (i, 0)),
            scratch_shapes=[
                pltpu.VMEM((B_pad, H), jnp.float32),                 # h carry
                pltpu.VMEM((B_pad, H), jnp.float32),                 # c carry
                pltpu.VMEM((t_block * B_pad, H), jnp.float32),       # h staging
                pltpu.VMEM((t_block * B_pad, H4), jnp.float32),      # pre staging
            ],
        ),
        compiler_params=pltpu.CompilerParams(
            dimension_semantics=("arbitrary",),   # sequential recurrence over time blocks
        ),
    )(x_flat, sbias, w_ih_ts_t, w_hh_t, w_proj_t_pad, b_proj_pad)

    return y_flat.reshape(T_pad, B_pad, C_out_pad)


# ------------------------------ Model wrapper ------------------------------ #
def init_params(key, c_in, c_out, hidden_size, initial_forget_bias=None):
    """Deterministic init mimicking PyTorch's U(-1/sqrt(H), 1/sqrt(H))."""
    ks = jax.random.split(key, 6)
    H = hidden_size
    bound = 1.0 / math.sqrt(H)
    u = lambda k, shape: jax.random.uniform(k, shape, jnp.float32, -bound, bound)

    w_ih = u(ks[0], (4 * H, c_in))     # PyTorch weight_ih_l0, columns = [x | c]
    w_hh = u(ks[1], (4 * H, H))        # PyTorch weight_hh_l0
    b_ih = u(ks[2], (4 * H,))
    b_hh = u(ks[3], (4 * H,))
    if initial_forget_bias is not None:
        b_hh = b_hh.at[H:2 * H].set(float(initial_forget_bias))

    w_proj = u(ks[4], (c_out, H))
    b_proj = jax.random.uniform(ks[5], (c_out,), jnp.float32, -bound, bound)

    return dict(w_ih=w_ih, w_hh=w_hh, b_ih=b_ih, b_hh=b_hh,
                w_proj=w_proj, b_proj=b_proj)


def combine_timeseries_and_statics(x, c):
    # x: (B, T, n_ts), c: (B, n_static) -> (B, T, n_ts + n_static)
    B, T, _ = x.shape
    c_rep = jnp.broadcast_to(c[:, None, :], (B, T, c.shape[-1]))
    return jnp.concatenate([x, c_rep], axis=-1)


def model_forward(params, batch_x, batch_c, hidden_size, t_block=64):
    """batch_x: (B, T, n_ts), batch_c: (B, n_static)."""
    B, T, n_ts = batch_x.shape
    H = hidden_size
    w_ih = params["w_ih"]                      # (4H, n_ts + n_static)
    w_hh = params["w_hh"]                      # (4H, H)
    bias = params["b_ih"] + params["b_hh"]     # (4H,)

    # Fold the time-invariant static-feature projection into a per-batch bias
    # (mathematically identical to concatenating statics onto every timestep).
    w_ih_ts = w_ih[:, :n_ts]                                   # (4H, n_ts)
    w_ih_st = w_ih[:, n_ts:]                                   # (4H, n_static)
    static_pre = batch_c.astype(jnp.float32) @ w_ih_st.T       # (B, 4H)
    sbias = static_pre + bias[None, :]                         # (B, 4H)

    B_pad = _round_up(max(B, 1), SUBLANE)
    C_out = params["w_proj"].shape[0]
    C_out_pad = _round_up(C_out, LANE)

    # Time-major x; pad batch rows to the sublane quantum. Padded rows (x = 0,
    # sbias = 0) provably keep h = c = 0 through the recurrence.
    x_tm = jnp.transpose(batch_x.astype(jnp.float32), (1, 0, 2))   # (T, B, n_ts)
    x_tm = jnp.pad(x_tm, ((0, 0), (0, B_pad - B), (0, 0)))
    sbias = jnp.pad(sbias, ((0, B_pad - B), (0, 0)))

    w_ih_ts_t = w_ih_ts.T                                      # (n_ts, 4H)
    w_hh_t = w_hh.T                                            # (H, 4H)
    # Lane-dense output projection weights.
    w_proj_t = jnp.pad(params["w_proj"].T, ((0, 0), (0, C_out_pad - C_out)))
    b_proj = jnp.pad(params["b_proj"], (0, C_out_pad - C_out))[None, :]

    y_all = lstm_project_pallas(x_tm, sbias, w_ih_ts_t, w_hh_t,
                                w_proj_t, b_proj, H, t_block=t_block)
    # (T_pad, B_pad, C_out_pad) -> (B, T, C_out)
    y = jnp.transpose(y_all[:T, :B, :C_out], (1, 0, 2))
    return {"outputs_time_series": y}


# --------------------------- Pure-JAX reference ---------------------------- #
def reference_forward(params, batch_x, batch_c, hidden_size):
    x = combine_timeseries_and_statics(batch_x, batch_c).astype(jnp.float32)
    B, T, _ = x.shape
    H = hidden_size
    w_ih, w_hh = params["w_ih"], params["w_hh"]
    b = params["b_ih"] + params["b_hh"]

    def step(carry, x_t):
        h, c = carry
        gates = x_t @ w_ih.T + h @ w_hh.T + b
        i = jax.nn.sigmoid(gates[:, 0 * H:1 * H])
        f = jax.nn.sigmoid(gates[:, 1 * H:2 * H])
        g = jnp.tanh(gates[:, 2 * H:3 * H])
        o = jax.nn.sigmoid(gates[:, 3 * H:4 * H])
        c_new = f * c + i * g
        h_new = o * jnp.tanh(c_new)
        return (h_new, c_new), h_new

    h0 = jnp.zeros((B, H), jnp.float32)
    c0 = jnp.zeros((B, H), jnp.float32)
    _, hs = lax.scan(step, (h0, c0), jnp.transpose(x, (1, 0, 2)))
    lstm_out = jnp.transpose(hs, (1, 0, 2))                    # (B, T, H)
    y = lstm_out @ params["w_proj"].T + params["b_proj"]
    return y


# ---------------------------------- main ----------------------------------- #
if __name__ == "__main__":
    # Small config consistent with the module
    B, T = 2, 8
    n_ts, n_static = 5, 3          # time_series_variables, static_variables
    c_in = n_ts + n_static
    c_out = 2                      # target_variables
    hidden = 32                    # d_model
    initial_forget_bias = 3.0

    key = jax.random.PRNGKey(0)
    k_params, k_x, k_c = jax.random.split(key, 3)

    params = init_params(k_params, c_in, c_out, hidden, initial_forget_bias)

    batch_x = jax.random.normal(k_x, (B, T, n_ts), jnp.float32)
    batch_c = jax.random.normal(k_c, (B, n_static), jnp.float32)

    # t_block=4 -> grid=(2,), exercises the VMEM h/c carry across grid steps.
    out = model_forward(params, batch_x, batch_c, hidden, t_block=4)
    y = jax.block_until_ready(out["outputs_time_series"])

    y_ref = reference_forward(params, batch_x, batch_c, hidden)
    assert y.shape == (B, T, c_out), y.shape
    assert jnp.allclose(y, y_ref, atol=1e-4, rtol=1e-4), "mismatch vs reference"

    print("KERNEL_OK")
</pallas_src>

<mosaic_0001>
module attributes {stable_mosaic.version = 11 : i64} {
  func.func @lstm_block_kernel(%arg0: i32, %arg1: memref<32x5xf32, #tpu.memory_space<vmem>>, %arg2: memref<8x128xf32, #tpu.memory_space<vmem>>, %arg3: memref<5x128xf32, #tpu.memory_space<vmem>>, %arg4: memref<32x128xf32, #tpu.memory_space<vmem>>, %arg5: memref<32x128xf32, #tpu.memory_space<vmem>>, %arg6: memref<1x128xf32, #tpu.memory_space<vmem>>, %arg7: memref<32x128xf32, #tpu.memory_space<vmem>>, %arg8: memref<8x32xf32, #tpu.memory_space<vmem>>, %arg9: memref<8x32xf32, #tpu.memory_space<vmem>>, %arg10: memref<32x32xf32, #tpu.memory_space<vmem>>, %arg11: memref<32x128xf32, #tpu.memory_space<vmem>>) attributes {dimension_semantics = [#tpu.dimension_semantics<arbitrary>], iteration_bounds = array<i64: 2>, scalar_prefetch = 0 : i64, scratch_operands = 4 : i64, tpu.core_type = #tpu.core_type<tc>, window_params = [{transform_indices = @transform_0, window_bounds = array<i64: 32, 5>}, {pipeline_mode = #tpu.pipeline_mode<synchronous>, transform_indices = @transform_1, window_bounds = array<i64: 8, 128>}, {pipeline_mode = #tpu.pipeline_mode<synchronous>, transform_indices = @transform_2, window_bounds = array<i64: 5, 128>}, {pipeline_mode = #tpu.pipeline_mode<synchronous>, transform_indices = @transform_3, window_bounds = array<i64: 32, 128>}, {pipeline_mode = #tpu.pipeline_mode<synchronous>, transform_indices = @transform_4, window_bounds = array<i64: 32, 128>}, {pipeline_mode = #tpu.pipeline_mode<synchronous>, transform_indices = @transform_5, window_bounds = array<i64: 1, 128>}, {transform_indices = @transform_6, window_bounds = array<i64: 32, 128>}]} {
    %c0_i32 = arith.constant 0 : i32
    %0 = arith.cmpi eq, %arg0, %c0_i32 : i32
    %1 = arith.extui %0 : i1 to i32
    %c0_i32_0 = arith.constant 0 : i32
    %2 = arith.cmpi ne, %1, %c0_i32_0 : i32
    scf.if %2 {
      %cst_48 = arith.constant 0.000000e+00 : f32
      %100 = vector.broadcast %cst_48 : f32 to vector<8x32xf32>
      %c0_49 = arith.constant 0 : index
      %c0_50 = arith.constant 0 : index
      %101 = vector.load %arg8[%c0_49, %c0_50] : memref<8x32xf32, #tpu.memory_space<vmem>>, vector<8x32xf32>
      tpu.vector_store %arg8[%c0_49, %c0_50], %100 {strides = array<i32>} : memref<8x32xf32, #tpu.memory_space<vmem>>, vector<8x32xf32>,
      %cst_51 = arith.constant 0.000000e+00 : f32
      %102 = vector.broadcast %cst_51 : f32 to vector<8x32xf32>
      %c0_52 = arith.constant 0 : index
      %c0_53 = arith.constant 0 : index
      %103 = vector.load %arg9[%c0_52, %c0_53] : memref<8x32xf32, #tpu.memory_space<vmem>>, vector<8x32xf32>
      tpu.vector_store %arg9[%c0_52, %c0_53], %102 {strides = array<i32>} : memref<8x32xf32, #tpu.memory_space<vmem>>, vector<8x32xf32>,
    } else {
    }
    %c0 = arith.constant 0 : index
    %c0_1 = arith.constant 0 : index
    %3 = vector.load %arg1[%c0, %c0_1] : memref<32x5xf32, #tpu.memory_space<vmem>>, vector<32x5xf32>
    %c0_2 = arith.constant 0 : index
    %c0_3 = arith.constant 0 : index
    %4 = vector.load %arg3[%c0_2, %c0_3] : memref<5x128xf32, #tpu.memory_space<vmem>>, vector<5x128xf32>
    %cst = arith.constant dense<0.000000e+00> : vector<32x128xf32>
    %5 = tpu.matmul %3, %4, %cst {dimension_numbers = #tpu.dot_dimension_numbers<[1], [0], [0], [1], [0, 0, 1, 1], [], []>} : vector<32x5xf32>, vector<5x128xf32>, vector<32x128xf32> -> vector<32x128xf32>
    %c0_4 = arith.constant 0 : index
    %c0_5 = arith.constant 0 : index
    %6 = vector.load %arg11[%c0_4, %c0_5] : memref<32x128xf32, #tpu.memory_space<vmem>>, vector<32x128xf32>
    tpu.vector_store %arg11[%c0_4, %c0_5], %5 {strides = array<i32>} : memref<32x128xf32, #tpu.memory_space<vmem>>, vector<32x128xf32>,
    %c0_6 = arith.constant 0 : index
    %c0_7 = arith.constant 0 : index
    %7 = vector.load %arg4[%c0_6, %c0_7] : memref<32x128xf32, #tpu.memory_space<vmem>>, vector<32x128xf32>
    %c0_8 = arith.constant 0 : index
    %c0_9 = arith.constant 0 : index
    %8 = vector.load %arg2[%c0_8, %c0_9] : memref<8x128xf32, #tpu.memory_space<vmem>>, vector<8x128xf32>
    %c0_10 = arith.constant 0 : index
    %c0_11 = arith.constant 0 : index
    %9 = vector.load %arg8[%c0_10, %c0_11] : memref<8x32xf32, #tpu.memory_space<vmem>>, vector<8x32xf32>
    %c0_12 = arith.constant 0 : index
    %c0_13 = arith.constant 0 : index
    %10 = vector.load %arg9[%c0_12, %c0_13] : memref<8x32xf32, #tpu.memory_space<vmem>>, vector<8x32xf32>
    %c0_14 = arith.constant 0 : index
    %c0_15 = arith.constant 0 : index
    %11 = vector.load %arg11[%c0_14, %c0_15] : memref<32x128xf32, #tpu.memory_space<vmem>>, vector<8x128xf32>
    %12 = arith.addf %11, %8 : vector<8x128xf32>
    %cst_16 = arith.constant dense<0.000000e+00> : vector<8x128xf32>
    %13 = tpu.matmul %9, %7, %cst_16 {dimension_numbers = #tpu.dot_dimension_numbers<[1], [0], [0], [1], [0, 0, 1, 1], [], []>} : vector<8x32xf32>, vector<32x128xf32>, vector<8x128xf32> -> vector<8x128xf32>
    %14 = arith.addf %12, %13 : vector<8x128xf32>
    %15 = arith.negf %14 : vector<8x128xf32>
    %16 = math.exp %15 : vector<8x128xf32>
    %cst_17 = arith.constant 1.000000e+00 : f32
    %17 = vector.broadcast %cst_17 : f32 to vector<8x128xf32>
    %18 = arith.addf %17, %16 : vector<8x128xf32>
    %19 = arith.divf %17, %18 : vector<8x128xf32>
    %20 = math.tanh %14 : vector<8x128xf32>
    %21 = vector.extract_strided_slice %19 {offsets = [0, 0], sizes = [8, 32], strides = [1, 1]} : vector<8x128xf32> to vector<8x32xf32>
    %22 = vector.extract_strided_slice %19 {offsets = [0, 32], sizes = [8, 32], strides = [1, 1]} : vector<8x128xf32> to vector<8x32xf32>
    %23 = vector.extract_strided_slice %20 {offsets = [0, 64], sizes = [8, 32], strides = [1, 1]} : vector<8x128xf32> to vector<8x32xf32>
    %24 = vector.extract_strided_slice %19 {offsets = [0, 96], sizes = [8, 32], strides = [1, 1]} : vector<8x128xf32> to vector<8x32xf32>
    %25 = arith.mulf %22, %10 : vector<8x32xf32>
    %26 = arith.mulf %21, %23 : vector<8x32xf32>
    %27 = arith.addf %25, %26 : vector<8x32xf32>
    %28 = math.tanh %27 : vector<8x32xf32>
    %29 = arith.mulf %24, %28 : vector<8x32xf32>
    %c0_18 = arith.constant 0 : index
    %c0_19 = arith.constant 0 : index
    %30 = vector.load %arg10[%c0_18, %c0_19] : memref<32x32xf32, #tpu.memory_space<vmem>>, vector<8x32xf32>
    tpu.vector_store %arg10[%c0_18, %c0_19], %29 {strides = array<i32>} : memref<32x32xf32, #tpu.memory_space<vmem>>, vector<8x32xf32>,
    %c8 = arith.constant 8 : index
    %c0_20 = arith.constant 0 : index
    %31 = vector.load %arg11[%c8, %c0_20] : memref<32x128xf32, #tpu.memory_space<vmem>>, vector<8x128xf32>
    %32 = arith.addf %31, %8 : vector<8x128xf32>
    %cst_21 = arith.constant dense<0.000000e+00> : vector<8x128xf32>
    %33 = tpu.matmul %29, %7, %cst_21 {dimension_numbers = #tpu.dot_dimension_numbers<[1], [0], [0], [1], [0, 0, 1, 1], [], []>} : vector<8x32xf32>, vector<32x128xf32>, vector<8x128xf32> -> vector<8x128xf32>
    %34 = arith.addf %32, %33 : vector<8x128xf32>
    %35 = arith.negf %34 : vector<8x128xf32>
    %36 = math.exp %35 : vector<8x128xf32>
    %cst_22 = arith.constant 1.000000e+00 : f32
    %37 = vector.broadcast %cst_22 : f32 to vector<8x128xf32>
    %38 = arith.addf %37, %36 : vector<8x128xf32>
    %39 = arith.divf %37, %38 : vector<8x128xf32>
    %40 = math.tanh %34 : vector<8x128xf32>
    %41 = vector.extract_strided_slice %39 {offsets = [0, 0], sizes = [8, 32], strides = [1, 1]} : vector<8x128xf32> to vector<8x32xf32>
    %42 = vector.extract_strided_slice %39 {offsets = [0, 32], sizes = [8, 32], strides = [1, 1]} : vector<8x128xf32> to vector<8x32xf32>
    %43 = vector.extract_strided_slice %40 {offsets = [0, 64], sizes = [8, 32], strides = [1, 1]} : vector<8x128xf32> to vector<8x32xf32>
    %44 = vector.extract_strided_slice %39 {offsets = [0, 96], sizes = [8, 32], strides = [1, 1]} : vector<8x128xf32> to vector<8x32xf32>
    %45 = arith.mulf %42, %27 : vector<8x32xf32>
    %46 = arith.mulf %41, %43 : vector<8x32xf32>
    %47 = arith.addf %45, %46 : vector<8x32xf32>
    %48 = math.tanh %47 : vector<8x32xf32>
    %49 = arith.mulf %44, %48 : vector<8x32xf32>
    %c8_23 = arith.constant 8 : index
    %c0_24 = arith.constant 0 : index
    %50 = vector.load %arg10[%c8_23, %c0_24] : memref<32x32xf32, #tpu.memory_space<vmem>>, vector<8x32xf32>
    tpu.vector_store %arg10[%c8_23, %c0_24], %49 {strides = array<i32>} : memref<32x32xf32, #tpu.memory_space<vmem>>, vector<8x32xf32>,
    %c16 = arith.constant 16 : index
    %c0_25 = arith.constant 0 : index
    %51 = vector.load %arg11[%c16, %c0_25] : memref<32x128xf32, #tpu.memory_space<vmem>>, vector<8x128xf32>
    %52 = arith.addf %51, %8 : vector<8x128xf32>
    %cst_26 = arith.constant dense<0.000000e+00> : vector<8x128xf32>
    %53 = tpu.matmul %49, %7, %cst_26 {dimension_numbers = #tpu.dot_dimension_numbers<[1], [0], [0], [1], [0, 0, 1, 1], [], []>} : vector<8x32xf32>, vector<32x128xf32>, vector<8x128xf32> -> vector<8x128xf32>
    %54 = arith.addf %52, %53 : vector<8x128xf32>
    %55 = arith.negf %54 : vector<8x128xf32>
    %56 = math.exp %55 : vector<8x128xf32>
    %cst_27 = arith.constant 1.000000e+00 : f32
    %57 = vector.broadcast %cst_27 : f32 to vector<8x128xf32>
    %58 = arith.addf %57, %56 : vector<8x128xf32>
    %59 = arith.divf %57, %58 : vector<8x128xf32>
    %60 = math.tanh %54 : vector<8x128xf32>
    %61 = vector.extract_strided_slice %59 {offsets = [0, 0], sizes = [8, 32], strides = [1, 1]} : vector<8x128xf32> to vector<8x32xf32>
    %62 = vector.extract_strided_slice %59 {offsets = [0, 32], sizes = [8, 32], strides = [1, 1]} : vector<8x128xf32> to vector<8x32xf32>
    %63 = vector.extract_strided_slice %60 {offsets = [0, 64], sizes = [8, 32], strides = [1, 1]} : vector<8x128xf32> to vector<8x32xf32>
    %64 = vector.extract_strided_slice %59 {offsets = [0, 96], sizes = [8, 32], strides = [1, 1]} : vector<8x128xf32> to vector<8x32xf32>
    %65 = arith.mulf %62, %47 : vector<8x32xf32>
    %66 = arith.mulf %61, %63 : vector<8x32xf32>
    %67 = arith.addf %65, %66 : vector<8x32xf32>
    %68 = math.tanh %67 : vector<8x32xf32>
    %69 = arith.mulf %64, %68 : vector<8x32xf32>
    %c16_28 = arith.constant 16 : index
    %c0_29 = arith.constant 0 : index
    %70 = vector.load %arg10[%c16_28, %c0_29] : memref<32x32xf32, #tpu.memory_space<vmem>>, vector<8x32xf32>
    tpu.vector_store %arg10[%c16_28, %c0_29], %69 {strides = array<i32>} : memref<32x32xf32, #tpu.memory_space<vmem>>, vector<8x32xf32>,
    %c24 = arith.constant 24 : index
    %c0_30 = arith.constant 0 : index
    %71 = vector.load %arg11[%c24, %c0_30] : memref<32x128xf32, #tpu.memory_space<vmem>>, vector<8x128xf32>
    %72 = arith.addf %71, %8 : vector<8x128xf32>
    %cst_31 = arith.constant dense<0.000000e+00> : vector<8x128xf32>
    %73 = tpu.matmul %69, %7, %cst_31 {dimension_numbers = #tpu.dot_dimension_numbers<[1], [0], [0], [1], [0, 0, 1, 1], [], []>} : vector<8x32xf32>, vector<32x128xf32>, vector<8x128xf32> -> vector<8x128xf32>
    %74 = arith.addf %72, %73 : vector<8x128xf32>
    %75 = arith.negf %74 : vector<8x128xf32>
    %76 = math.exp %75 : vector<8x128xf32>
    %cst_32 = arith.constant 1.000000e+00 : f32
    %77 = vector.broadcast %cst_32 : f32 to vector<8x128xf32>
    %78 = arith.addf %77, %76 : vector<8x128xf32>
    %79 = arith.divf %77, %78 : vector<8x128xf32>
    %80 = math.tanh %74 : vector<8x128xf32>
    %81 = vector.extract_strided_slice %79 {offsets = [0, 0], sizes = [8, 32], strides = [1, 1]} : vector<8x128xf32> to vector<8x32xf32>
    %82 = vector.extract_strided_slice %79 {offsets = [0, 32], sizes = [8, 32], strides = [1, 1]} : vector<8x128xf32> to vector<8x32xf32>
    %83 = vector.extract_strided_slice %80 {offsets = [0, 64], sizes = [8, 32], strides = [1, 1]} : vector<8x128xf32> to vector<8x32xf32>
    %84 = vector.extract_strided_slice %79 {offsets = [0, 96], sizes = [8, 32], strides = [1, 1]} : vector<8x128xf32> to vector<8x32xf32>
    %85 = arith.mulf %82, %67 : vector<8x32xf32>
    %86 = arith.mulf %81, %83 : vector<8x32xf32>
    %87 = arith.addf %85, %86 : vector<8x32xf32>
    %88 = math.tanh %87 : vector<8x32xf32>
    %89 = arith.mulf %84, %88 : vector<8x32xf32>
    %c24_33 = arith.constant 24 : index
    %c0_34 = arith.constant 0 : index
    %90 = vector.load %arg10[%c24_33, %c0_34] : memref<32x32xf32, #tpu.memory_space<vmem>>, vector<8x32xf32>
    tpu.vector_store %arg10[%c24_33, %c0_34], %89 {strides = array<i32>} : memref<32x32xf32, #tpu.memory_space<vmem>>, vector<8x32xf32>,
    %c0_35 = arith.constant 0 : index
    %c0_36 = arith.constant 0 : index
    %91 = vector.load %arg8[%c0_35, %c0_36] : memref<8x32xf32, #tpu.memory_space<vmem>>, vector<8x32xf32>
    tpu.vector_store %arg8[%c0_35, %c0_36], %89 {strides = array<i32>} : memref<8x32xf32, #tpu.memory_space<vmem>>, vector<8x32xf32>,
    %c0_37 = arith.constant 0 : index
    %c0_38 = arith.constant 0 : index
    %92 = vector.load %arg9[%c0_37, %c0_38] : memref<8x32xf32, #tpu.memory_space<vmem>>, vector<8x32xf32>
    tpu.vector_store %arg9[%c0_37, %c0_38], %87 {strides = array<i32>} : memref<8x32xf32, #tpu.memory_space<vmem>>, vector<8x32xf32>,
    %c0_39 = arith.constant 0 : index
    %c0_40 = arith.constant 0 : index
    %93 = vector.load %arg10[%c0_39, %c0_40] : memref<32x32xf32, #tpu.memory_space<vmem>>, vector<32x32xf32>
    %c0_41 = arith.constant 0 : index
    %c0_42 = arith.constant 0 : index
    %94 = vector.load %arg5[%c0_41, %c0_42] : memref<32x128xf32, #tpu.memory_space<vmem>>, vector<32x128xf32>
    %cst_43 = arith.constant dense<0.000000e+00> : vector<32x128xf32>
    %95 = tpu.matmul %93, %94, %cst_43 {dimension_numbers = #tpu.dot_dimension_numbers<[1], [0], [0], [1], [0, 0, 1, 1], [], []>} : vector<32x32xf32>, vector<32x128xf32>, vector<32x128xf32> -> vector<32x128xf32>
    %c0_44 = arith.constant 0 : index
    %c0_45 = arith.constant 0 : index
    %96 = vector.load %arg6[%c0_44, %c0_45] : memref<1x128xf32, #tpu.memory_space<vmem>>, vector<1x128xf32>
    %97 = vector.broadcast %96 : vector<1x128xf32> to vector<32x128xf32>
    %98 = arith.addf %95, %97 : vector<32x128xf32>
    %c0_46 = arith.constant 0 : index
    %c0_47 = arith.constant 0 : index
    %99 = vector.load %arg7[%c0_46, %c0_47] : memref<32x128xf32, #tpu.memory_space<vmem>>, vector<32x128xf32>
    tpu.vector_store %arg7[%c0_46, %c0_47], %98 {strides = array<i32>} : memref<32x128xf32, #tpu.memory_space<vmem>>, vector<32x128xf32>,
    return
  }
  func.func @transform_0(%arg0: i32) -> (i32, i32) {
    %c0_i32 = arith.constant 0 : i32
    %c0_i32_0 = arith.constant 0 : i32
    return %arg0, %c0_i32 : i32, i32
  }
  func.func @transform_1(%arg0: i32) -> (i32, i32) {
    %c0_i32 = arith.constant 0 : i32
    %c0_i32_0 = arith.constant 0 : i32
    %c0_i32_1 = arith.constant 0 : i32
    return %c0_i32, %c0_i32_0 : i32, i32
  }
  func.func @transform_2(%arg0: i32) -> (i32, i32) {
    %c0_i32 = arith.constant 0 : i32
    %c0_i32_0 = arith.constant 0 : i32
    %c0_i32_1 = arith.constant 0 : i32
    return %c0_i32, %c0_i32_0 : i32, i32
  }
  func.func @transform_3(%arg0: i32) -> (i32, i32) {
    %c0_i32 = arith.constant 0 : i32
    %c0_i32_0 = arith.constant 0 : i32
    %c0_i32_1 = arith.constant 0 : i32
    return %c0_i32, %c0_i32_0 : i32, i32
  }
  func.func @transform_4(%arg0: i32) -> (i32, i32) {
    %c0_i32 = arith.constant 0 : i32
    %c0_i32_0 = arith.constant 0 : i32
    %c0_i32_1 = arith.constant 0 : i32
    return %c0_i32, %c0_i32_0 : i32, i32
  }
  func.func @transform_5(%arg0: i32) -> (i32, i32) {
    %c0_i32 = arith.constant 0 : i32
    %c0_i32_0 = arith.constant 0 : i32
    %c0_i32_1 = arith.constant 0 : i32
    return %c0_i32, %c0_i32_0 : i32, i32
  }
  func.func @transform_6(%arg0: i32) -> (i32, i32) {
    %c0_i32 = arith.constant 0 : i32
    %c0_i32_0 = arith.constant 0 : i32
    return %arg0, %c0_i32 : i32, i32
  }
}

</mosaic_0001>

<bundles_post_ra>
// kernel: tpu_custom_call.1
= control target key start
LH: loop header
LB: loop body
LE: loop exit
PB: predicated region body
PF: predicated region fallthrough
CT: control target
= control target key end

     0   :  { %11 = vsyncpa [#allocation7], 0  ;;  %s1677_s0 = inlined_call_operand.vmem [shape: f32[64,5], index: 0, kind: input, shape index: {}]   ;;  %s1678_s1 = inlined_call_operand.vmem [shape: f32[8,128], index: 1, kind: input, shape index: {}]   ;;  %s1679_s2 = inlined_call_operand.hbm [shape: f32[5,128], index: 2, kind: input, shape index: {}]   ;;  %s1680_s3 = inlined_call_operand.vmem [shape: f32[32,128], index: 3, kind: input, shape index: {}]   ;;  %s1681_s4 = inlined_call_operand.vmem [shape: f32[32,128], index: 4, kind: input, shape index: {}]   ;;  %s1682_s5 = inlined_call_operand.vmem [shape: f32[1,128], index: 5, kind: input, shape index: {}]   ;;  %s1683_s6 = inlined_call_operand.hbm [shape: f32[64,128], index: 6, kind: output, shape index: {}]  }
   0x1   :  { %12 = vsyncpa [#allocation8], 0 }
   0x2   :  { %14 = vsyncpa [#allocation8 + $0x1], 0  ;;  %s1421_s21 = smov 0   ;;  %s1423_s22 = smov 0  }
   0x3   :  { %s1425_s23 = smov 0   ;;  %s1427_s24 = smov 0  }
   0x4 LB: > { %s1442_s25 = sadd.s32 4294967295, %s1373_s24   ;;  %s1023_s26 = sadd.s32 4294967294, %s1373_s24   ;;  %s1373_s24 = sphi %s1427_s24, %s1700_s24   ;;  %s1369_s23 = sphi %s1425_s23, %s1699_s23   ;;  %s1365_s22 = sphi %s1423_s22, %s1698_s22   ;;  %s1361_s21 = sphi %s1421_s21, %s1697_s21  }
   0x5   : > { %s1446_s27 = sadd.s32 1, %s1373_s24   ;;  %s158_s28 = sadd.s32 1, %s1369_s23 }
   0x6   : > { %s155_s29 = ssub.s32 %s1373_s24, %s1446_s27  ;;  %p168_p0 = scmp.ne.s32.totalorder %s1369_s23, %s1365_s22 }
   0x7   : > { %p156_p1 = scmp.eq.s32.totalorder %s155_s29, 0  ;;  %p169_p2 = scmp.eq.s32.totalorder %s1442_s25, 1 }
   0x8   : > { %p174_p3 = scmp.ne.s32.totalorder %s1365_s22, %s1361_s21  ;;  %p175_p4 = scmp.eq.s32.totalorder %s1023_s26, 1 }
   0x9   : > { %s1457_s30 = scalar_select %p156_p1, %s1369_s23, %s158_s28  }
   0xa   : > { %p1459_p5 = por %p169_p2, %p168_p0  ;;  %p1463_p6 = por %p175_p4, %p174_p3 }
   0xb   : > { %p1024_p7 = scmp.ge.s32.totalorder %s1373_s24, 1  ;;  %p182_p8 = scmp.lt.s32.totalorder %s1373_s24, 3 }
   0xc   : > { %s1687_s7 = scalar_select %p1459_p5, 1, 0 }
   0xd   : > { %s1688_s8 = scalar_select %p1463_p6, 1, 0 }
   0xe   : > { %p1684_p10 = scmp.eq.s32.totalorder %s1442_s25, 0  ;;  %p1471_p11 = pnand %p1024_p7, %p182_p8 }
   0xf   : > { %s1375_s10 = smov [#allocation6]   ;;  %s1279_s15 = scalar_lea.hbm %s1679_s2, 128 }
  0x10   : > { %s1689_s9 = scalar_select %p1471_p11, 1, 0 }
  0x11   : > { %s198_s11 = sshll.u32 %s1375_s10, 4  ;;  %p1194_p12 = pneg %p1471_p11  ;;  %s199_s11 = int_to_ptr.vmem [resolvable:$true] %s198_s11 }
  0x12   : > { %p1280_p0 = scmp.ne.s32.totalorder %s1679_s2, %s1279_s15  ;;  %p1286_p4 = scmp.lt.u32.totalorder %s1279_s15, %s1679_s2 }
  0x13   : > { %p1479_p13 = pnand %p1684_p10, %p1194_p12 }
  0x15   : > { %p1281_p1 = pneg %p1479_p13 }
  0x17   : > { %p1282_p2 = pnand %p1281_p1, %p1280_p0 }
  0x19   : > { %p1283_p3 = pneg %p1282_p2 }
  0x1b   : > { %p1288_p7 = pnand %p1286_p4, %p1283_p3 }
  0x1d   : > { %1291 = shalt.err (!%p1288_p7)
}
  0x1e   : > { %s1292_s20 = scalar_lea.vmem %s199_s11, 128  ;;  %p1300_p10 = scmp.lt.s32.totalorder %s199_s11, %s199_s11 }
  0x1f   : > { %p1293_p8 = scmp.ne.s32.totalorder %s199_s11, %s1292_s20  ;;  %p1301_p6 = scmp.lt.s32.totalorder %s1292_s20, %s1292_s20 }
  0x21   : > { %p1295_p12 = pnand %p1293_p8, %p1281_p1  ;;  %p1302_p5 = por %p1301_p6, %p1300_p10 }
  0x23   : > { %p1296_p9 = pneg %p1295_p12 }
  0x25   : > { %p1303_p11 = pnand %p1302_p5, %p1296_p9 }
  0x27   : > { %1306 = shalt.err (!%p1303_p11)
}
  0x28   : > { %1197 = dma.hbm_to_vmem [thread:$0]  (!%p1479_p13), %s1679_s2, 128, %s199_s11, [#allocation7]  }
  0x29   : > { %p1691_p0 = scmp.ne.s32.totalorder %s1689_s9, 0 }
  0x2a   : > { %p1692_p2 = scmp.eq.s32.totalorder (!%p1691_p0), %s1442_s25, 0 }
  0x2b   : > { %229 = sbr.rel (%p1691_p0) target bundleno = 3118 (0xc2e), region = 44 }
  0x32   : > { %1352 = dma.done.wait (%p1692_p2), [#allocation7], 128   ;;  %p1693_p1 = pmov %p1692_p2 }
  0x33   : > { %s256_s29 = sand.u32 1, %s1365_s22   ;;  %s1030_s10 = sshll.u32 %s1442_s25, 2 }
  0x34   : > { %1354 = vsyncadd (%p1693_p1), [#allocation7], 4294967168  ;;  %s1029_s12 = sshll.u32 %s256_s29, 5  ;;  %p260_p5 = scmp.lt.s32.totalorder %s1030_s10, 7 }
  0x35   : > { %s1514_s15 = scalar_lea.vmem [#allocation9], %s1029_s12  ;;  %p1694_p6 = scmp.ne.s32.totalorder %s1442_s25, 0 }
  0x36   : > { %s1702_s10 = smov (!%p260_p5, %s1030_s10), 7  ;;  %vm270_vm0 = vcmask (!%p1694_p6), 261120   ;;  %v1376_v0 = vmov (!%p1694_p6), 0.0  }
  0x37   : > { %s1031_s13 = sshll.u32 %s1702_s10, 3  ;;  %269 = sbr.rel (%p1694_p6) target bundleno = 62 (0x3e), region = 52  ;;  %271 = vst.msk [vmem:[#allocation2] sm:$0xff] (!%p1694_p6), %vm270_vm0, %v1376_v0  ;;  %272 = vst.msk [vmem:[#allocation3] sm:$0xff] (!%p1694_p6), %vm270_vm0, %v1376_v0 }
  0x38   : > { %s1512_s9 = scalar_lea.vmem %s1677_s0, %s1031_s13 }
  0x3e PF: > { %v384_v1 = vld [vmem:[%s1680_s3] sm:$0xff]  ;;  %v385_v2 = vld [vmem:[%s1680_s3 + $0x8] sm:$0xff]  ;;  %v277_v3 = vld [vmem:[#allocation6] sm:$0x1f]  ;;  %vm291_vm1 = vcmask 1044480   ;;  %v1377_v4 = vmov 0.0|0.0  }
  0x3f   : > { %1156 = vmatprep.subr.bf16.mxu0 %v1377_v4  ;;  %v1525_v5 = vpack.c.bf16 %v385_v2, %v384_v1  ;;  %1090 = vmatprep.subr.msk.mxu1 %vm291_vm1, %v277_v3  ;;  %v273_v6 = vld [vmem:[%s1512_s9] sm:$0xff]  ;;  %vm278_vm2 = vcmask 39936   ;;  %v274_v7 = vld [vmem:[%s1512_s9 + $0x8] sm:$0xff]  ;;  %v386_v8 = vld [vmem:[%s1680_s3 + $0x10] sm:$0xff]  ;;  %vm1378_vm3 = vmmov 0   ;;  %v1379_v11 = vmov 0.0  }
  0x40   : > { %1091 = vmatpush3.msk.msra.mxu1 %vm291_vm1, %v277_v3  ;;  %1092 = vmatprep.mubr.msk.f32.mxu1 %vm278_vm2, %v273_v6  ;;  %v387_v9 = vld [vmem:[%s1680_s3 + $0x18] sm:$0xff]  ;;  %v389_v12 = vld [vmem:[#allocation2] sm:$0xff]  ;;  %vm393_vm4 = vcmask 261120   ;;  %s1380_s11 = smov 64   ;;  %v390_v21 = vld [vmem:[#allocation3] sm:$0xff]  ;;  %s1381_s14 = smov 32  }
  0x41   : > { %1158 = vmatpush3.bf16.msra.mxu0 %v1525_v5  ;;  %1093 = vmatmul.mubr.msk.f32.vlgmr.msra.gmra.mrb[0].mxu1 %vm278_vm2, %v274_v7  ;;  %v1160_v10 = vpack.c.bf16 %v387_v9, %v386_v8  ;;  %v1554_v14 = vld [vmem:[%s1678_s1] sm:$0xff]  ;;  %v275_v50 = vld [vmem:[%s1512_s9 + $0x10] sm:$0xff]  ;;  %v276_v51 = vld [vmem:[%s1512_s9 + $0x18] sm:$0xff]  ;;  %s1382_s13 = smov 96   ;;  %s949_s16 = sshll.u32 %s1514_s15, 4  ;;  %s1629_s16 = int_to_ptr.vmem [resolvable:$true] %s949_s16 }
  0x42   : > { %1159 = vmatprep.subr.bf16.mxu0 %v1377_v4  ;;  %1106 = vmatprep.mubr.msk.f32.mxu0 %vm1378_vm3, %v1379_v11  ;;  %v823_v53 = vld [vmem:[%s1681_s4] sm:$0xff]  ;;  %v824_v54 = vld [vmem:[%s1681_s4 + $0x8] sm:$0xff]  ;;  %v825_v60 = vld [vmem:[%s1681_s4 + $0x10] sm:$0xff]  ;;  %s1307_s19 = scalar_lea.vmem %s1629_s16, 512  ;;  %p1695_p10 = scmp.ne.s32.totalorder %s1687_s7, 0 }
  0x43   : > { %1168 = vmatprep.subr.bf16.mxu1 %v1377_v4  ;;  %1095 = vmatprep.mubr.msk.f32.mxu1 %vm278_vm2, %v275_v50  ;;  %v1180_v55 = vpack.c.bf16 %v824_v54, %v823_v53  ;;  %v826_v61 = vld [vmem:[%s1681_s4 + $0x18] sm:$0xff]  ;;  %v1599_v6 = vld [vmem:[%s1682_s5] ss:$0 sm:$0xff]  ;;  %p1308_p9 = scmp.ne.s32.totalorder %s1629_s16, %s1307_s19  ;;  %s1383_s9 = smov [#allocation9]  }
  0x44   : > { %1170 = vmatpush3.bf16.msra.mxu1 %v1525_v5  ;;  %v1184_v62 = vpack.c.bf16 %v826_v61, %v825_v60  ;;  %s1311_s20 = sshll.u32 %s1383_s9, 4  ;;  %s1312_s20 = int_to_ptr.vmem [resolvable:$false] %s1311_s20 }
  0x45   : > { %1161 = vmatpush3.bf16.msra.mxu0 %v1160_v10  ;;  %1171 = vmatprep.subr.bf16.mxu1 %v1377_v4  ;;  %p1309_p11 = pnand %p1308_p9, %p1695_p10  ;;  %s1313_s26 = scalar_lea.vmem %s1312_s20, 1024 }
  0x46   : > { %1162 = vmatprep.subr.bf16.mxu0 %v1377_v4  ;;  %1096 = vmatmul.mubr.msk.f32.gmra.mrb[2].mxu1 %vm278_vm2, %v276_v51  ;;  %p1314_p3 = scmp.lt.s32.totalorder %s1629_s16, %s1312_s20  ;;  %p1315_p4 = scmp.lt.s32.totalorder %s1313_s26, %s1307_s19 }
  0x47   : > { %1128 = vmatprep.mubr.msk.f32.mxu1 %vm1378_vm3, %v1379_v11  ;;  %p1310_p13 = pneg %p1309_p11 }
  0x48   : > { %1107 = vmatmul.mubr.msk.f32.vlgmr.msra.gmra.mrb[0].mxu0 %vm393_vm4, %v389_v12  ;;  %1173 = vmatpush3.bf16.msra.mxu1 %v1160_v10  ;;  %p1316_p7 = por %p1315_p4, %p1314_p3 }
  0x49   : > { %1164 = vmatpush3.bf16.msra.mxu0 %v1525_v5  ;;  %1117 = vmatprep.mubr.msk.f32.mxu0 %vm1378_vm3, %v1379_v11 }
  0x4a   : > { %1165 = vmatprep.subr.bf16.mxu0 %v1377_v4  ;;  %1181 = vmatprep.subr.bf16.mxu1 %v1180_v55  ;;  %p1317_p8 = pnand %p1316_p7, %p1310_p13 }
  0x4d   : > { %1167 = vmatpush3.bf16.msra.mxu0 %v1160_v10 }
  0x4e   : > { %1174 = vmatprep.subr.bf16.mxu0 %v1377_v4 }
 0x114   : > { %v1094_v13 = vpop.f32.mrb[0].mxu1 }
 0x115   : > { %v361_v15 = vpop.f32.mrb[1].mxu1  ;;  %v502_v36 = vadd.f32 %v1094_v13, %v1554_v14 }
 0x116   : > { %v392_v16 = vadd.f32 %v1554_v14, %v361_v15 }
 0x119   : > { %v1097_v58 = vpop.f32.mrb[2].mxu1 }
 0x11a   : > { %v371_v59 = vpop.f32.mrb[3].mxu1 }
 0x11b   : > { %v463_v17 = vpop.f32.mrb[0].mxu0  ;;  %v606_v2 = vadd.f32 %v1554_v14, %v371_v59 }
 0x11c   : > { %v467_v18 = vadd.f32 %v463_v17, %v392_v16  ;;  %v1108_v19 = vpop.f32.mrb[1].mxu0 }
 0x11e   : > { %1247 = vtanh.f32 %v467_v18  ;;  %v1039_v22 = vmul.f32 -1.442695, %v467_v18 }
 0x120   : > { %1249 = vpow2.f32 %v1039_v22 }
 0x128   : > { %v1248_v20 = vpop.eup %1247 }
 0x129   : > { %481 = vrot.lane.b32.xlu0 %v1248_v20, %s1380_s11 }
 0x12a   : > { %v1250_v23 = vpop.eup %1249 }
 0x12b   : > { %v471_v24 = vadd.f32 1.0, %v1250_v23 }
 0x12d   : > { %476 = vrot.lane.b32.xlu0 %v390_v21, %s1381_s14  ;;  %1251 = vrcp.f32 %v471_v24 }
 0x137   : > { %v1252_v25 = vpop.eup %1251 }
 0x19b   : > { %v482_v26 = vpop.permute.xlu0 %481 }
 0x19c   : > { %v484_v27 = vmul.f32 %v1252_v25, %v482_v26 }
 0x19e   : > { %486 = vrot.lane.b32.xlu1 %v484_v27, %s1381_s14  ;;  %v710_v27 = vadd.f32 %v1097_v58, %v1554_v14 }
 0x19f   : > { %v477_v28 = vpop.permute.xlu0 %476 }
 0x1a0   : > { %v479_v29 = vmul.f32 %v1252_v25, %v477_v28 }
 0x210   : > { %v487_v30 = vpop.permute.xlu1 %486 }
 0x211   : > { %v489_v31 = vadd.f32 %v487_v30, %v479_v29 }
 0x213   : > { %1253 = vtanh.f32 %v489_v31 }
 0x21d   : > { %v1254_v32 = vpop.eup %1253 }
 0x21e   : > { %492 = vrot.lane.b32.xlu1 %v1254_v32, %s1380_s11 }
 0x290   : > { %v493_v33 = vpop.permute.xlu1 %492 }
 0x291   : > { %v495_v34 = vmul.f32 %v1252_v25, %v493_v33 }
 0x293   : > { %497 = vrot.lane.b32.xlu0 %v495_v34, %s1381_s14 }
 0x305   : > { %v498_v35 = vpop.permute.xlu0 %497 }
 0x306   : > { %500 = vst.msk [vmem:[#allocation4] sm:$0xff] %vm393_vm4, %v498_v35  ;;  %1118 = vmatmul.mubr.msk.f32.vlgmr.msra.gmra.mrb[2].mxu0 %vm393_vm4, %v498_v35 }
 0x307   : > { %1176 = vmatpush3.bf16.msra.mxu0 %v1525_v5  ;;  %1139 = vmatprep.mubr.msk.f32.mxu0 %vm1378_vm3, %v1379_v11 }
 0x308   : > { %1177 = vmatprep.subr.bf16.mxu0 %v1377_v4 }
 0x30b   : > { %1179 = vmatpush3.bf16.msra.mxu0 %v1160_v10 }
 0x30d   : > { %v819_v0 = vld [vmem:[#allocation4] sm:$0xff] }
 0x3d9   : > { %v571_v37 = vpop.f32.mrb[2].mxu0 }
 0x3da   : > { %v575_v38 = vadd.f32 %v571_v37, %v502_v36  ;;  %v1119_v39 = vpop.f32.mrb[3].mxu0 }
 0x3dc   : > { %1255 = vtanh.f32 %v575_v38  ;;  %v1041_v41 = vmul.f32 -1.442695, %v575_v38 }
 0x3de   : > { %1257 = vpow2.f32 %v1041_v41 }
 0x3e6   : > { %v1256_v40 = vpop.eup %1255 }
 0x3e7   : > { %585 = vrot.lane.b32.xlu1 %v1256_v40, %s1380_s11 }
 0x3e8   : > { %v1258_v42 = vpop.eup %1257 }
 0x3e9   : > { %v579_v43 = vadd.f32 1.0, %v1258_v42 }
 0x3eb   : > { %1259 = vrcp.f32 %v579_v43 }
 0x3f5   : > { %v1260_v44 = vpop.eup %1259 }
 0x3f6   : > { %v583_v47 = vmul.f32 %v1260_v44, %v489_v31 }
 0x459   : > { %v586_v45 = vpop.permute.xlu1 %585 }
 0x45a   : > { %v588_v46 = vmul.f32 %v1260_v44, %v586_v45 }
 0x45c   : > { %590 = vrot.lane.b32.xlu0 %v588_v46, %s1381_s14 }
 0x4ce   : > { %v591_v48 = vpop.permute.xlu0 %590 }
 0x4cf   : > { %v593_v49 = vadd.f32 %v591_v48, %v583_v47 }
 0x4d1   : > { %1261 = vtanh.f32 %v593_v49 }
 0x4db   : > { %v1262_v52 = vpop.eup %1261 }
 0x4dc   : > { %596 = vrot.lane.b32.xlu1 %v1262_v52, %s1380_s11 }
 0x54e   : > { %v597_v56 = vpop.permute.xlu1 %596 }
 0x54f   : > { %v599_v57 = vmul.f32 %v1260_v44, %v597_v56 }
 0x551   : > { %601 = vrot.lane.b32.xlu0 %v599_v57, %s1381_s14 }
 0x5c3   : > { %v602_v63 = vpop.permute.xlu0 %601 }
 0x5c4   : > { %604 = vst.msk [vmem:[#allocation4 + $0x8] sm:$0xff] %vm393_vm4, %v602_v63  ;;  %1129 = vmatmul.mubr.msk.f32.vlgmr.msra.gmra.mrb[4].mxu1 %vm393_vm4, %v602_v63 }
 0x5c5   : > { %1183 = vmatpush3.bf16.msra.mxu1 %v1180_v55  ;;  %1150 = vmatprep.mubr.msk.f32.mxu1 %vm393_vm4, %v819_v0 }
 0x5c6   : > { %1185 = vmatprep.subr.bf16.mxu1 %v1184_v62 }
 0x5c9   : > { %1187 = vmatpush3.bf16.msra.mxu1 %v1184_v62 }
 0x5cb   : > { %v820_v1 = vld [vmem:[#allocation4 + $0x8] sm:$0xff] }
 0x5cc   : > { %1151 = vmatmul.mubr.msk.f32.vlgmr.msra.gmra.mrb[6].mxu1 %vm393_vm4, %v820_v1 }
 0x697   : > { %v675_v3 = vpop.f32.mrb[4].mxu1 }
 0x698   : > { %v679_v4 = vadd.f32 %v675_v3, %v606_v2  ;;  %v1130_v5 = vpop.f32.mrb[5].mxu1 }
 0x69a   : > { %1263 = vtanh.f32 %v679_v4  ;;  %v1043_v12 = vmul.f32 -1.442695, %v679_v4 }
 0x69c   : > { %1265 = vpow2.f32 %v1043_v12 }
 0x69f   : > { %v1152_v7 = vpop.f32.mrb[6].mxu1 }
 0x6a0   : > { %v918_v8 = vadd.f32 %v1152_v7, %v1599_v6  ;;  %v912_v9 = vpop.f32.mrb[7].mxu1 }
 0x6a1   : > { %v913_v10 = vadd.f32 %v1599_v6, %v912_v9 }
 0x6a2   : > { %932 = vst [vmem:[%s1514_s15 + $0x8] sm:$0xff] %v918_v8 }
 0x6a3   : > { %931 = vst [vmem:[%s1514_s15] sm:$0xff] %v913_v10 }
 0x6a4   : > { %v1264_v11 = vpop.eup %1263 }
 0x6a5   : > { %689 = vrot.lane.b32.xlu1 %v1264_v11, %s1380_s11 }
 0x6a6   : > { %v1266_v13 = vpop.eup %1265 }
 0x6a7   : > { %v683_v15 = vadd.f32 1.0, %v1266_v13 }
 0x6a9   : > { %1267 = vrcp.f32 %v683_v15 }
 0x6b3   : > { %v1268_v16 = vpop.eup %1267 }
 0x6b4   : > { %v687_v19 = vmul.f32 %v1268_v16, %v593_v49 }
 0x717   : > { %v690_v17 = vpop.permute.xlu1 %689 }
 0x718   : > { %v692_v18 = vmul.f32 %v1268_v16, %v690_v17 }
 0x71a   : > { %694 = vrot.lane.b32.xlu0 %v692_v18, %s1381_s14 }
 0x78c   : > { %v695_v20 = vpop.permute.xlu0 %694 }
 0x78d   : > { %v697_v21 = vadd.f32 %v695_v20, %v687_v19 }
 0x78f   : > { %1269 = vtanh.f32 %v697_v21 }
 0x799   : > { %v1270_v22 = vpop.eup %1269 }
 0x79a   : > { %700 = vrot.lane.b32.xlu1 %v1270_v22, %s1380_s11 }
 0x80c   : > { %v701_v23 = vpop.permute.xlu1 %700 }
 0x80d   : > { %v703_v24 = vmul.f32 %v1268_v16, %v701_v23 }
 0x80f   : > { %705 = vrot.lane.b32.xlu0 %v703_v24, %s1381_s14 }
 0x881   : > { %v706_v25 = vpop.permute.xlu0 %705 }
 0x882   : > { %708 = vst.msk [vmem:[#allocation4 + $0x10] sm:$0xff] %vm393_vm4, %v706_v25  ;;  %1140 = vmatmul.mubr.msk.f32.vlgmr.msra.gmra.mrb[4].mxu0 %vm393_vm4, %v706_v25 }
 0x889   : > { %v821_v26 = vld [vmem:[#allocation4 + $0x10] sm:$0xff] }
 0x88a   : > { %1153 = vmatprep.mubr.msk.f32.mxu1 %vm393_vm4, %v821_v26 }
 0x955   : > { %v779_v28 = vpop.f32.mrb[4].mxu0 }
 0x956   : > { %v783_v29 = vadd.f32 %v779_v28, %v710_v27  ;;  %v1141_v30 = vpop.f32.mrb[5].mxu0 }
 0x958   : > { %1271 = vtanh.f32 %v783_v29  ;;  %v1045_v32 = vmul.f32 -1.442695, %v783_v29 }
 0x95a   : > { %1273 = vpow2.f32 %v1045_v32 }
 0x962   : > { %v1272_v31 = vpop.eup %1271 }
 0x963   : > { %793 = vrot.lane.b32.xlu1 %v1272_v31, %s1380_s11 }
 0x964   : > { %v1274_v33 = vpop.eup %1273 }
 0x965   : > { %v787_v34 = vadd.f32 1.0, %v1274_v33 }
 0x967   : > { %1275 = vrcp.f32 %v787_v34 }
 0x971   : > { %v1276_v35 = vpop.eup %1275 }
 0x972   : > { %v791_v38 = vmul.f32 %v1276_v35, %v697_v21 }
 0x9d5   : > { %v794_v36 = vpop.permute.xlu1 %793 }
 0x9d6   : > { %v796_v37 = vmul.f32 %v1276_v35, %v794_v36 }
 0x9d8   : > { %798 = vrot.lane.b32.xlu0 %v796_v37, %s1381_s14 }
 0xa4a   : > { %v799_v39 = vpop.permute.xlu0 %798 }
 0xa4b   : > { %v801_v14 = vadd.f32 %v799_v39, %v791_v38 }
 0xa4d   : > { %1277 = vtanh.f32 %v801_v14 }
 0xa57   : > { %v1278_v40 = vpop.eup %1277 }
 0xa58   : > { %804 = vrot.lane.b32.xlu1 %v1278_v40, %s1380_s11  ;;  %s1056_s11 = sshll.u32 %s1442_s25, 9  ;;  %s1636_s25 = scalar_lea.sflag [#allocation8], %s256_s29 }
 0xa59   : > { %s1627_s18 = scalar_lea.hbm %s1683_s6, %s1056_s11 }
 0xa5c   : > { %815 = vrot.lane.b32.xlu1 %v801_v14, %s1382_s13 }
 0xaca   : > { %v805_v41 = vpop.permute.xlu1 %804 }
 0xacb   : > { %v807_v42 = vmul.f32 %v1276_v35, %v805_v41 }
 0xacd   : > { %809 = vrot.lane.b32.xlu0 %v807_v42, %s1381_s14 }
 0xace   : > { %v816_v43 = vpop.permute.xlu1 %815 }
 0xacf   : > { %818 = vst.msk [vmem:[#allocation3] sm:$0xff] %vm393_vm4, %v816_v43 }
 0xb3f   : > { %v810_v44 = vpop.permute.xlu0 %809 }
 0xb40   : > { %812 = vst.msk [vmem:[#allocation4 + $0x18] sm:$0xff] %vm393_vm4, %v810_v44  ;;  %813 = vst.msk [vmem:[#allocation2] sm:$0xff] %vm393_vm4, %v810_v44 }
 0xb47   : > { %v822_v45 = vld [vmem:[#allocation4 + $0x18] sm:$0xff] }
 0xb48   : > { %1154 = vmatmul.mubr.msk.f32.gmra.mrb[8].mxu1 %vm393_vm4, %v822_v45 }
 0xc1b   : > { %v1155_v46 = vpop.f32.mrb[8].mxu1 }
 0xc1c   : > { %v928_v47 = vadd.f32 %v1155_v46, %v1599_v6  ;;  %v922_v48 = vpop.f32.mrb[9].mxu1 }
 0xc1d   : > { %v923_v49 = vadd.f32 %v1599_v6, %v922_v48 }
 0xc1e   : > { %934 = vst [vmem:[%s1514_s15 + $0x18] sm:$0xff] %v928_v47 }
 0xc1f   : > { %933 = vst [vmem:[%s1514_s15 + $0x10] sm:$0xff] %v923_v49 }
 0xc20   : > { %1320 = shalt.err (!%p1317_p8)
}
 0xc21   : > { %s1321_s29 = scalar_lea.hbm %s1627_s18, 512  ;;  %s1325_s10 = scalar_lea.hbm %s1683_s6, 1024 }
 0xc22   : > { %p1322_p12 = scmp.ne.s32.totalorder %s1627_s18, %s1321_s29  ;;  %p1326_p1 = scmp.lt.u32.totalorder %s1627_s18, %s1683_s6 }
 0xc23   : > { %p1327_p5 = scmp.lt.u32.totalorder %s1325_s10, %s1321_s29  ;;  %p1329_p9 = scmp.lt.u32.totalorder %s1321_s29, %s1627_s18 }
 0xc24   : > { %p1323_p0 = pnand %p1322_p12, %p1695_p10 }
 0xc25   : > { %p1328_p6 = por %p1327_p5, %p1326_p1 }
 0xc26   : > { %p1324_p2 = pneg %p1323_p0 }
 0xc27   : > { %p1330_p11 = por %p1329_p9, %p1328_p6 }
 0xc29   : > { %p1331_p13 = pnand %p1330_p11, %p1324_p2 }
 0xc2b   : > { %1334 = shalt.err (!%p1331_p13)
}
 0xc2c   : > { %s1384_s11 = smov 128   ;;  %s1385_s14 = smov 8  }
 0xc2d   : > { %1192 = dma.vmem_to_hbm [thread:$0]  (%p1695_p10), %s1629_s16, 512, %s1627_s18, %s1636_s25, %s1384_s11, %s1384_s11, %s1385_s14  }
 0xc2e PF: > { %p1204_p3 = scmp.ge.s32.totalorder %s1373_s24, 2  ;;  %s964_s17 = sand.u32 1, %s1361_s21  }
 0xc2f   : > { %p1696_p4 = scmp.ne.s32.totalorder %s1688_s8, 0  ;;  %s965_s19 = scalar_lea.sflag [#allocation8], %s964_s17 }
 0xc31   : > { %p1199_p7 = pnand %p1204_p3, %p1696_p4 }
 0xc33   : > { %1356 = dma.done.wait (!%p1199_p7), %s965_s19, 512  }
 0xc34   : > { %1358 = vsyncadd (!%p1199_p7), %s965_s19, 4294966784  ;;  %p17_p8 = scmp.ge.s32.totalorder %s1446_s27, 4   ;;  %s1697_s21 = smov %s1365_s22 }
 0xc35   : > { %s1698_s22 = smov %s1369_s23  ;;  %s1699_s23 = smov %s1457_s30 }
 0xc36   : > { %s1700_s24 = smov %s1446_s27  ;;  %19 = sbr.rel (!%p17_p8) target bundleno = 4 (0x4), region = 88 }
 0xc3d   :  { %970 = vsyncpa [#allocation7], 1 }
 0xc3e   :  { %972 = vsyncpa [#allocation7 + $0x1], 1 }
 0xc3f   :  { %973 = vsyncpa [#allocation8], 1 }
 0xc40   :  { %975 = vsyncpa [#allocation8 + $0x1], 1 }

</bundles_post_ra>
